<compile_context>
chip_gen: v5e
topology: v5e:2x2
jax: 0.10.0
libtpu: 0.0.40
codegen_flags: <defaults>
</compile_context>

<pallas_src>
import functools

import jax
import jax.numpy as jnp
from jax import lax
from jax.experimental import pallas as pl
from jax.experimental.pallas import tpu as pltpu

_EPS = 1e-5
_LANES = 128


def _cdiv(a, b):
    return -(-a // b)


def _round_up(a, b):
    return _cdiv(a, b) * b


# ---------------------------------------------------------------------------
# Streaming path: stats kernel (per-tile lane partials) + apply kernel.
# ---------------------------------------------------------------------------

def _stats_kernel(x_ref, sum_ref, sumsq_ref, *, hw, tn, ch, ragged):
    """One lane-tile of the packed [B*C, HW] view -> [B*C, 128] partials."""
    t = pl.program_id(0)
    bc = x_ref.shape[0]
    nch = tn // ch
    base = t * tn
    lane = lax.broadcasted_iota(jnp.int32, (1, _LANES), 1) if ragged else None

    def chunk(i, s, ss):
        if isinstance(i, int):
            off = i * ch
        else:
            off = pl.multiple_of(i * ch, _LANES)
        xc = x_ref[:, pl.ds(off, ch)].astype(jnp.float32)          # [BC, ch]
        for j in range(ch // _LANES):
            xs = xc[:, j * _LANES:(j + 1) * _LANES]                # [BC, 128]
            if ragged:
                valid = (base + off + j * _LANES + lane) < hw
                xs = jnp.where(valid, xs, 0.0)
            s = s + xs
            ss = ss + xs * xs
        return s, ss

    zero = jnp.zeros((bc, _LANES), jnp.float32)
    if nch <= 16:
        s, ss = zero, zero
        for i in range(nch):                      # static unroll (trace time)
            s, ss = chunk(i, s, ss)
    else:
        s, ss = lax.fori_loop(0, nch,
                              lambda i, c: chunk(i, c[0], c[1]),
                              (zero, zero))
    sum_ref[...] = s
    sumsq_ref[...] = ss


def _apply_kernel(x_ref, scale_ref, shift_ref, o_ref, *, tn, ch):
    """out = x * scale + shift, chunked over lanes (mul + add only)."""
    s = scale_ref[...]                                             # [BC, 1]
    h = shift_ref[...]
    nch = tn // ch

    def chunk(i):
        if isinstance(i, int):
            off = i * ch
        else:
            off = pl.multiple_of(i * ch, _LANES)
        xc = x_ref[:, pl.ds(off, ch)].astype(jnp.float32)
        o_ref[:, pl.ds(off, ch)] = (xc * s + h).astype(o_ref.dtype)

    if nch <= 16:
        for i in range(nch):
            chunk(i)
    else:
        def body(i, carry):
            chunk(i)
            return carry
        lax.fori_loop(0, nch, body, 0)


# ---------------------------------------------------------------------------
# Fused single-read fast path (whole tensor VMEM-resident).
# ---------------------------------------------------------------------------

def _fused_kernel(x_ref, gamma_ref, beta_ref, o_ref, sum_scr, sumsq_scr,
                  *, inv_n, ch):
    b_dim, _, hw = x_ref.shape
    sum_scr[...] = jnp.zeros_like(sum_scr)
    sumsq_scr[...] = jnp.zeros_like(sumsq_scr)

    # Pass 1: per-channel 128-lane partial sums from the resident copy.
    for b in range(b_dim):
        for off in range(0, hw, ch):
            w = min(ch, hw - off)
            xc = x_ref[b, :, off:off + w].astype(jnp.float32)      # [C, w]
            for j in range(0, w, _LANES):
                jw = min(_LANES, w - j)
                xs = xc[:, j:j + jw]
                if jw == _LANES:
                    sum_scr[...] += xs
                    sumsq_scr[...] += xs * xs
                else:
                    sum_scr[:, :jw] += xs
                    sumsq_scr[:, :jw] += xs * xs

    mean = jnp.sum(sum_scr[...], axis=-1, keepdims=True) * inv_n   # [C, 1]
    var = jnp.maximum(
        jnp.sum(sumsq_scr[...], axis=-1, keepdims=True) * inv_n - mean * mean,
        0.0)
    scale = gamma_ref[...] * lax.rsqrt(var + _EPS)                 # [C, 1]
    shift = beta_ref[...] - mean * scale

    # Pass 2: normalize from the resident copy (no second HBM read of x).
    for b in range(b_dim):
        for off in range(0, hw, ch):
            w = min(ch, hw - off)
            xc = x_ref[b, :, off:off + w].astype(jnp.float32)
            o_ref[b, :, off:off + w] = (xc * scale + shift).astype(o_ref.dtype)


# ---------------------------------------------------------------------------
# Wrapper
# ---------------------------------------------------------------------------

def _vmem_capacity_bytes():
    try:
        return int(pltpu.get_tpu_info().vmem_capacity_bytes)
    except Exception:
        return 64 * 1024 * 1024      # conservative (v7x physical VMEM)


def _pick_tiles(hw, bc, itemsize, ws_budget, max_lanes):
    """Largest lane tile (multiple of 128) whose 4-buffer working set
    (double-buffered input + output block) fits the working-set budget."""
    hw128 = _round_up(hw, _LANES)
    tn = ws_budget // (4 * bc * itemsize)
    tn = max(_LANES, min(tn, 65536))
    if max_lanes is not None:
        tn = max(_LANES, min(tn, max_lanes))
    tn = (tn // _LANES) * _LANES
    tn = min(tn, hw128)
    # Compute-chunk size: largest of 512/256/128 dividing the tile.
    ch = 512 if tn % 512 == 0 else 256 if tn % 256 == 0 else _LANES
    return tn, ch


def batchlayer(x, gamma, beta, *, force_streaming=False,
               max_lanes_per_block=None):
    """x: [B, C, H, W] (NCHW); gamma/beta: [1, C, 1, 1]. Returns [B, C, H, W]."""
    B, C, H, W = x.shape
    HW = H * W
    BC = B * C
    inv_n = 1.0 / float(B * HW)
    itemsize = jnp.dtype(x.dtype).itemsize
    phys_vmem = _vmem_capacity_bytes()

    g2 = gamma.reshape(C, 1).astype(jnp.float32)
    b2 = beta.reshape(C, 1).astype(jnp.float32)

    # ------------------ fused single-read fast path ------------------
    io_bytes = 2 * BC * HW * itemsize               # x block + out block
    resident = 2 * io_bytes + 2 * C * _LANES * 4 + (1 << 20)
    n_static_chunks = B * _cdiv(HW, 512)
    if (not force_streaming
            and resident <= int(0.35 * phys_vmem)
            and n_static_chunks <= 128):
        vmem_limit = min(int(0.8 * phys_vmem),
                         max(32 << 20, resident + (16 << 20)))
        x3 = x.reshape(B, C, HW)
        out3 = pl.pallas_call(
            functools.partial(_fused_kernel, inv_n=inv_n, ch=512),
            out_shape=jax.ShapeDtypeStruct((B, C, HW), x.dtype),
            grid=(1,),
            in_specs=[pl.BlockSpec((B, C, HW), lambda i: (0, 0, 0)),
                      pl.BlockSpec((C, 1), lambda i: (0, 0)),
                      pl.BlockSpec((C, 1), lambda i: (0, 0))],
            out_specs=pl.BlockSpec((B, C, HW), lambda i: (0, 0, 0)),
            scratch_shapes=[pltpu.VMEM((C, _LANES), jnp.float32),
                            pltpu.VMEM((C, _LANES), jnp.float32)],
            compiler_params=pltpu.CompilerParams(
                dimension_semantics=("arbitrary",),
                vmem_limit_bytes=vmem_limit),
        )(x3, g2, b2)
        return out3.reshape(B, C, H, W)

    # ------------------ streaming two-call path ------------------
    ws_budget = (24 << 20) if phys_vmem >= (96 << 20) else (16 << 20)
    vmem_limit = min(int(0.8 * phys_vmem),
                     max(32 << 20, 2 * ws_budget + (8 << 20)))
    TN, CH = _pick_tiles(HW, BC, itemsize, ws_budget, max_lanes_per_block)
    T = _cdiv(HW, TN)
    HWp = T * TN
    ragged = (HW % TN) != 0

    x2 = x.reshape(BC, HW)                          # free, contiguous reshape
    cparams = pltpu.CompilerParams(
        dimension_semantics=("parallel",),          # v7x: tiles split over both TCs
        vmem_limit_bytes=vmem_limit)

    # Pass 1: per-tile [BC, 128] lane partials of sum and sum(x^2).
    part_sum, part_sq = pl.pallas_call(
        functools.partial(_stats_kernel, hw=HW, tn=TN, ch=CH, ragged=ragged),
        out_shape=(jax.ShapeDtypeStruct((T, BC, _LANES), jnp.float32),
                   jax.ShapeDtypeStruct((T, BC, _LANES), jnp.float32)),
        grid=(T,),
        in_specs=[pl.BlockSpec((BC, TN), lambda t: (0, t))],
        out_specs=(pl.BlockSpec((None, BC, _LANES), lambda t: (t, 0, 0)),
                   pl.BlockSpec((None, BC, _LANES), lambda t: (t, 0, 0))),
        compiler_params=cparams,
    )(x2)

    # Tiny reduction + fused per-channel affine parameters (plain XLA ops).
    row_sum = jnp.sum(part_sum, axis=(0, 2)).reshape(B, C)
    row_sq = jnp.sum(part_sq, axis=(0, 2)).reshape(B, C)
    mean = jnp.sum(row_sum, axis=0) * inv_n                         # [C]
    var = jnp.maximum(jnp.sum(row_sq, axis=0) * inv_n - mean * mean, 0.0)
    scale_c = g2[:, 0] * lax.rsqrt(var + _EPS)
    shift_c = b2[:, 0] - mean * scale_c
    scale_r = jnp.tile(scale_c, B).reshape(BC, 1)                   # per packed row
    shift_r = jnp.tile(shift_c, B).reshape(BC, 1)

    # Pass 2: out = x * scale + shift.  Output is padded to a whole number of
    # tiles (no out-of-bounds writes) and sliced back afterwards if ragged.
    out2 = pl.pallas_call(
        functools.partial(_apply_kernel, tn=TN, ch=CH),
        out_shape=jax.ShapeDtypeStruct((BC, HWp), x.dtype),
        grid=(T,),
        in_specs=[pl.BlockSpec((BC, TN), lambda t: (0, t)),
                  pl.BlockSpec((BC, 1), lambda t: (0, 0)),    # scale: resident
                  pl.BlockSpec((BC, 1), lambda t: (0, 0))],   # shift: resident
        out_specs=pl.BlockSpec((BC, TN), lambda t: (0, t)),
        compiler_params=cparams,
    )(x2, scale_r, shift_r)

    if HWp != HW:
        out2 = out2[:, :HW]
    return out2.reshape(B, C, H, W)


# ---------------------------------------------------------------------------
# Pure-JAX reference of the PyTorch forward.
# ---------------------------------------------------------------------------

def _reference(x, gamma, beta):
    eps = 1e-5
    mean = jnp.mean(x, axis=(0, 2, 3), keepdims=True)
    a = x - mean
    b = a / jnp.sqrt(jnp.mean(a * a, axis=(0, 2, 3), keepdims=True) + eps)
    return b * gamma + beta


if __name__ == "__main__":
    key = jax.random.PRNGKey(0)
    kx, kg, kb = jax.random.split(key, 3)

    B, C, H, W = 2, 4, 16, 16
    x = jax.random.normal(kx, (B, C, H, W), dtype=jnp.float32)
    # Deterministic parameter init, mirroring .uniform_(-0.1, 0.1)
    gamma = jax.random.uniform(kg, (1, C, 1, 1), minval=-0.1, maxval=0.1,
                               dtype=jnp.float32)
    beta = jax.random.uniform(kb, (1, C, 1, 1), minval=-0.1, maxval=0.1,
                              dtype=jnp.float32)

    def _check(xx, tag, **kw):
        out = jax.block_until_ready(batchlayer(xx, gamma, beta, **kw))
        ref = _reference(xx, gamma, beta)
        err = float(jnp.max(jnp.abs(out - ref)))
        assert out.shape == xx.shape and err < 1e-4, (tag, err)

    # 1) default: VMEM-resident single-read fused path
    _check(x, "fused")
    # 2) streaming two-call path with multiple lane tiles (T > 1)
    _check(x, "stream", force_streaming=True, max_lanes_per_block=128)
    # 3) ragged spatial size (HW not a multiple of 128), streaming path
    x_odd = jax.random.normal(kx, (B, C, 15, 15), dtype=jnp.float32)
    _check(x_odd, "stream-ragged", force_streaming=True,
           max_lanes_per_block=128)
    # 4) ragged spatial size, fused path
    _check(x_odd, "fused-ragged")

    print("KERNEL_OK")
</pallas_src>

<mosaic_0001>
module attributes {stable_mosaic.version = 11 : i64} {
  func.func @_fused_kernel(%arg0: i32, %arg1: memref<2x4x256xf32, #tpu.memory_space<vmem>>, %arg2: memref<4x1xf32, #tpu.memory_space<vmem>>, %arg3: memref<4x1xf32, #tpu.memory_space<vmem>>, %arg4: memref<2x4x256xf32, #tpu.memory_space<vmem>>, %arg5: memref<4x128xf32, #tpu.memory_space<vmem>>, %arg6: memref<4x128xf32, #tpu.memory_space<vmem>>) attributes {dimension_semantics = [#tpu.dimension_semantics<arbitrary>], iteration_bounds = array<i64: 1>, scalar_prefetch = 0 : i64, scratch_operands = 2 : i64, tpu.core_type = #tpu.core_type<tc>, window_params = [{pipeline_mode = #tpu.pipeline_mode<synchronous>, transform_indices = @transform_0, window_bounds = array<i64: 2, 4, 256>}, {pipeline_mode = #tpu.pipeline_mode<synchronous>, transform_indices = @transform_1, window_bounds = array<i64: 4, 1>}, {pipeline_mode = #tpu.pipeline_mode<synchronous>, transform_indices = @transform_2, window_bounds = array<i64: 4, 1>}, {pipeline_mode = #tpu.pipeline_mode<synchronous>, transform_indices = @transform_3, window_bounds = array<i64: 2, 4, 256>}]} {
    %cst = arith.constant 0.000000e+00 : f32
    %0 = vector.broadcast %cst : f32 to vector<4x128xf32>
    %c0 = arith.constant 0 : index
    %c0_0 = arith.constant 0 : index
    %1 = vector.load %arg5[%c0, %c0_0] : memref<4x128xf32, #tpu.memory_space<vmem>>, vector<4x128xf32>
    tpu.vector_store %arg5[%c0, %c0_0], %0 {strides = array<i32>} : memref<4x128xf32, #tpu.memory_space<vmem>>, vector<4x128xf32>,
    %cst_1 = arith.constant 0.000000e+00 : f32
    %2 = vector.broadcast %cst_1 : f32 to vector<4x128xf32>
    %c0_2 = arith.constant 0 : index
    %c0_3 = arith.constant 0 : index
    %3 = vector.load %arg6[%c0_2, %c0_3] : memref<4x128xf32, #tpu.memory_space<vmem>>, vector<4x128xf32>
    tpu.vector_store %arg6[%c0_2, %c0_3], %2 {strides = array<i32>} : memref<4x128xf32, #tpu.memory_space<vmem>>, vector<4x128xf32>,
    %c0_4 = arith.constant 0 : index
    %c0_5 = arith.constant 0 : index
    %c0_6 = arith.constant 0 : index
    %4 = vector.load %arg1[%c0_4, %c0_5, %c0_6] : memref<2x4x256xf32, #tpu.memory_space<vmem>>, vector<1x4x256xf32>
    %5 = vector.shape_cast %4 : vector<1x4x256xf32> to vector<4x256xf32>
    %6 = vector.extract_strided_slice %5 {offsets = [0, 0], sizes = [4, 128], strides = [1, 1]} : vector<4x256xf32> to vector<4x128xf32>
    %c0_7 = arith.constant 0 : index
    %c0_8 = arith.constant 0 : index
    %7 = vector.load %arg5[%c0_7, %c0_8] : memref<4x128xf32, #tpu.memory_space<vmem>>, vector<4x128xf32>
    %8 = arith.addf %7, %6 : vector<4x128xf32>
    %c0_9 = arith.constant 0 : index
    %c0_10 = arith.constant 0 : index
    %9 = vector.load %arg5[%c0_9, %c0_10] : memref<4x128xf32, #tpu.memory_space<vmem>>, vector<4x128xf32>
    tpu.vector_store %arg5[%c0_9, %c0_10], %8 {strides = array<i32>} : memref<4x128xf32, #tpu.memory_space<vmem>>, vector<4x128xf32>,
    %c0_11 = arith.constant 0 : index
    %c0_12 = arith.constant 0 : index
    %10 = vector.load %arg6[%c0_11, %c0_12] : memref<4x128xf32, #tpu.memory_space<vmem>>, vector<4x128xf32>
    %11 = arith.mulf %6, %6 : vector<4x128xf32>
    %12 = arith.addf %10, %11 : vector<4x128xf32>
    %c0_13 = arith.constant 0 : index
    %c0_14 = arith.constant 0 : index
    %13 = vector.load %arg6[%c0_13, %c0_14] : memref<4x128xf32, #tpu.memory_space<vmem>>, vector<4x128xf32>
    tpu.vector_store %arg6[%c0_13, %c0_14], %12 {strides = array<i32>} : memref<4x128xf32, #tpu.memory_space<vmem>>, vector<4x128xf32>,
    %14 = vector.extract_strided_slice %5 {offsets = [0, 128], sizes = [4, 128], strides = [1, 1]} : vector<4x256xf32> to vector<4x128xf32>
    %c0_15 = arith.constant 0 : index
    %c0_16 = arith.constant 0 : index
    %15 = vector.load %arg5[%c0_15, %c0_16] : memref<4x128xf32, #tpu.memory_space<vmem>>, vector<4x128xf32>
    %16 = arith.addf %15, %14 : vector<4x128xf32>
    %c0_17 = arith.constant 0 : index
    %c0_18 = arith.constant 0 : index
    %17 = vector.load %arg5[%c0_17, %c0_18] : memref<4x128xf32, #tpu.memory_space<vmem>>, vector<4x128xf32>
    tpu.vector_store %arg5[%c0_17, %c0_18], %16 {strides = array<i32>} : memref<4x128xf32, #tpu.memory_space<vmem>>, vector<4x128xf32>,
    %c0_19 = arith.constant 0 : index
    %c0_20 = arith.constant 0 : index
    %18 = vector.load %arg6[%c0_19, %c0_20] : memref<4x128xf32, #tpu.memory_space<vmem>>, vector<4x128xf32>
    %19 = arith.mulf %14, %14 : vector<4x128xf32>
    %20 = arith.addf %18, %19 : vector<4x128xf32>
    %c0_21 = arith.constant 0 : index
    %c0_22 = arith.constant 0 : index
    %21 = vector.load %arg6[%c0_21, %c0_22] : memref<4x128xf32, #tpu.memory_space<vmem>>, vector<4x128xf32>
    tpu.vector_store %arg6[%c0_21, %c0_22], %20 {strides = array<i32>} : memref<4x128xf32, #tpu.memory_space<vmem>>, vector<4x128xf32>,
    %c1 = arith.constant 1 : index
    %c0_23 = arith.constant 0 : index
    %c0_24 = arith.constant 0 : index
    %22 = vector.load %arg1[%c1, %c0_23, %c0_24] : memref<2x4x256xf32, #tpu.memory_space<vmem>>, vector<1x4x256xf32>
    %23 = vector.shape_cast %22 : vector<1x4x256xf32> to vector<4x256xf32>
    %24 = vector.extract_strided_slice %23 {offsets = [0, 0], sizes = [4, 128], strides = [1, 1]} : vector<4x256xf32> to vector<4x128xf32>
    %c0_25 = arith.constant 0 : index
    %c0_26 = arith.constant 0 : index
    %25 = vector.load %arg5[%c0_25, %c0_26] : memref<4x128xf32, #tpu.memory_space<vmem>>, vector<4x128xf32>
    %26 = arith.addf %25, %24 : vector<4x128xf32>
    %c0_27 = arith.constant 0 : index
    %c0_28 = arith.constant 0 : index
    %27 = vector.load %arg5[%c0_27, %c0_28] : memref<4x128xf32, #tpu.memory_space<vmem>>, vector<4x128xf32>
    tpu.vector_store %arg5[%c0_27, %c0_28], %26 {strides = array<i32>} : memref<4x128xf32, #tpu.memory_space<vmem>>, vector<4x128xf32>,
    %c0_29 = arith.constant 0 : index
    %c0_30 = arith.constant 0 : index
    %28 = vector.load %arg6[%c0_29, %c0_30] : memref<4x128xf32, #tpu.memory_space<vmem>>, vector<4x128xf32>
    %29 = arith.mulf %24, %24 : vector<4x128xf32>
    %30 = arith.addf %28, %29 : vector<4x128xf32>
    %c0_31 = arith.constant 0 : index
    %c0_32 = arith.constant 0 : index
    %31 = vector.load %arg6[%c0_31, %c0_32] : memref<4x128xf32, #tpu.memory_space<vmem>>, vector<4x128xf32>
    tpu.vector_store %arg6[%c0_31, %c0_32], %30 {strides = array<i32>} : memref<4x128xf32, #tpu.memory_space<vmem>>, vector<4x128xf32>,
    %32 = vector.extract_strided_slice %23 {offsets = [0, 128], sizes = [4, 128], strides = [1, 1]} : vector<4x256xf32> to vector<4x128xf32>
    %c0_33 = arith.constant 0 : index
    %c0_34 = arith.constant 0 : index
    %33 = vector.load %arg5[%c0_33, %c0_34] : memref<4x128xf32, #tpu.memory_space<vmem>>, vector<4x128xf32>
    %34 = arith.addf %33, %32 : vector<4x128xf32>
    %c0_35 = arith.constant 0 : index
    %c0_36 = arith.constant 0 : index
    %35 = vector.load %arg5[%c0_35, %c0_36] : memref<4x128xf32, #tpu.memory_space<vmem>>, vector<4x128xf32>
    tpu.vector_store %arg5[%c0_35, %c0_36], %34 {strides = array<i32>} : memref<4x128xf32, #tpu.memory_space<vmem>>, vector<4x128xf32>,
    %c0_37 = arith.constant 0 : index
    %c0_38 = arith.constant 0 : index
    %36 = vector.load %arg6[%c0_37, %c0_38] : memref<4x128xf32, #tpu.memory_space<vmem>>, vector<4x128xf32>
    %37 = arith.mulf %32, %32 : vector<4x128xf32>
    %38 = arith.addf %36, %37 : vector<4x128xf32>
    %c0_39 = arith.constant 0 : index
    %c0_40 = arith.constant 0 : index
    %39 = vector.load %arg6[%c0_39, %c0_40] : memref<4x128xf32, #tpu.memory_space<vmem>>, vector<4x128xf32>
    tpu.vector_store %arg6[%c0_39, %c0_40], %38 {strides = array<i32>} : memref<4x128xf32, #tpu.memory_space<vmem>>, vector<4x128xf32>,
    %c0_41 = arith.constant 0 : index
    %c0_42 = arith.constant 0 : index
    %40 = vector.load %arg5[%c0_41, %c0_42] : memref<4x128xf32, #tpu.memory_space<vmem>>, vector<4x128xf32>
    %cst_43 = arith.constant dense<0.000000e+00> : vector<4xf32>
    %41 = vector.multi_reduction <add>, %40, %cst_43 [1] : vector<4x128xf32> to vector<4xf32>
    %42 = vector.shape_cast %41 : vector<4xf32> to vector<4x1xf32>
    %cst_44 = arith.constant 0.001953125 : f32
    %43 = vector.broadcast %cst_44 : f32 to vector<4x1xf32>
    %44 = arith.mulf %42, %43 : vector<4x1xf32>
    %c0_45 = arith.constant 0 : index
    %c0_46 = arith.constant 0 : index
    %45 = vector.load %arg6[%c0_45, %c0_46] : memref<4x128xf32, #tpu.memory_space<vmem>>, vector<4x128xf32>
    %cst_47 = arith.constant dense<0.000000e+00> : vector<4xf32>
    %46 = vector.multi_reduction <add>, %45, %cst_47 [1] : vector<4x128xf32> to vector<4xf32>
    %47 = vector.shape_cast %46 : vector<4xf32> to vector<4x1xf32>
    %cst_48 = arith.constant 0.001953125 : f32
    %48 = vector.broadcast %cst_48 : f32 to vector<4x1xf32>
    %49 = arith.mulf %47, %48 : vector<4x1xf32>
    %50 = arith.mulf %44, %44 : vector<4x1xf32>
    %51 = arith.subf %49, %50 : vector<4x1xf32>
    %cst_49 = arith.constant 0.000000e+00 : f32
    %52 = vector.broadcast %cst_49 : f32 to vector<4x1xf32>
    %53 = arith.maximumf %51, %52 : vector<4x1xf32>
    %c0_50 = arith.constant 0 : index
    %c0_51 = arith.constant 0 : index
    %54 = vector.load %arg2[%c0_50, %c0_51] : memref<4x1xf32, #tpu.memory_space<vmem>>, vector<4x1xf32>
    %cst_52 = arith.constant 9.99999974E-6 : f32
    %55 = vector.broadcast %cst_52 : f32 to vector<4x1xf32>
    %56 = arith.addf %53, %55 : vector<4x1xf32>
    %57 = math.rsqrt %56 : vector<4x1xf32>
    %58 = arith.mulf %54, %57 : vector<4x1xf32>
    %c0_53 = arith.constant 0 : index
    %c0_54 = arith.constant 0 : index
    %59 = vector.load %arg3[%c0_53, %c0_54] : memref<4x1xf32, #tpu.memory_space<vmem>>, vector<4x1xf32>
    %60 = arith.mulf %44, %58 : vector<4x1xf32>
    %61 = arith.subf %59, %60 : vector<4x1xf32>
    %c0_55 = arith.constant 0 : index
    %c0_56 = arith.constant 0 : index
    %c0_57 = arith.constant 0 : index
    %62 = vector.load %arg1[%c0_55, %c0_56, %c0_57] : memref<2x4x256xf32, #tpu.memory_space<vmem>>, vector<1x4x256xf32>
    %63 = vector.shape_cast %62 : vector<1x4x256xf32> to vector<4x256xf32>
    %64 = vector.broadcast %58 : vector<4x1xf32> to vector<4x256xf32>
    %65 = arith.mulf %63, %64 : vector<4x256xf32>
    %66 = vector.broadcast %61 : vector<4x1xf32> to vector<4x256xf32>
    %67 = arith.addf %65, %66 : vector<4x256xf32>
    %c0_58 = arith.constant 0 : index
    %c0_59 = arith.constant 0 : index
    %c0_60 = arith.constant 0 : index
    %68 = vector.load %arg4[%c0_58, %c0_59, %c0_60] : memref<2x4x256xf32, #tpu.memory_space<vmem>>, vector<1x4x256xf32>
    %69 = vector.shape_cast %68 : vector<1x4x256xf32> to vector<4x256xf32>
    %70 = vector.shape_cast %67 : vector<4x256xf32> to vector<1x4x256xf32>
    tpu.vector_store %arg4[%c0_58, %c0_59, %c0_60], %70 {strides = array<i32>} : memref<2x4x256xf32, #tpu.memory_space<vmem>>, vector<1x4x256xf32>,
    %c1_61 = arith.constant 1 : index
    %c0_62 = arith.constant 0 : index
    %c0_63 = arith.constant 0 : index
    %71 = vector.load %arg1[%c1_61, %c0_62, %c0_63] : memref<2x4x256xf32, #tpu.memory_space<vmem>>, vector<1x4x256xf32>
    %72 = vector.shape_cast %71 : vector<1x4x256xf32> to vector<4x256xf32>
    %73 = vector.broadcast %58 : vector<4x1xf32> to vector<4x256xf32>
    %74 = arith.mulf %72, %73 : vector<4x256xf32>
    %75 = vector.broadcast %61 : vector<4x1xf32> to vector<4x256xf32>
    %76 = arith.addf %74, %75 : vector<4x256xf32>
    %c1_64 = arith.constant 1 : index
    %c0_65 = arith.constant 0 : index
    %c0_66 = arith.constant 0 : index
    %77 = vector.load %arg4[%c1_64, %c0_65, %c0_66] : memref<2x4x256xf32, #tpu.memory_space<vmem>>, vector<1x4x256xf32>
    %78 = vector.shape_cast %77 : vector<1x4x256xf32> to vector<4x256xf32>
    %79 = vector.shape_cast %76 : vector<4x256xf32> to vector<1x4x256xf32>
    tpu.vector_store %arg4[%c1_64, %c0_65, %c0_66], %79 {strides = array<i32>} : memref<2x4x256xf32, #tpu.memory_space<vmem>>, vector<1x4x256xf32>,
    return
  }
  func.func @transform_0(%arg0: i32) -> (i32, i32, i32) {
    %c0_i32 = arith.constant 0 : i32
    %c0_i32_0 = arith.constant 0 : i32
    %c0_i32_1 = arith.constant 0 : i32
    %c0_i32_2 = arith.constant 0 : i32
    return %c0_i32, %c0_i32_0, %c0_i32_1 : i32, i32, i32
  }
  func.func @transform_1(%arg0: i32) -> (i32, i32) {
    %c0_i32 = arith.constant 0 : i32
    %c0_i32_0 = arith.constant 0 : i32
    %c0_i32_1 = arith.constant 0 : i32
    return %c0_i32, %c0_i32_0 : i32, i32
  }
  func.func @transform_2(%arg0: i32) -> (i32, i32) {
    %c0_i32 = arith.constant 0 : i32
    %c0_i32_0 = arith.constant 0 : i32
    %c0_i32_1 = arith.constant 0 : i32
    return %c0_i32, %c0_i32_0 : i32, i32
  }
  func.func @transform_3(%arg0: i32) -> (i32, i32, i32) {
    %c0_i32 = arith.constant 0 : i32
    %c0_i32_0 = arith.constant 0 : i32
    %c0_i32_1 = arith.constant 0 : i32
    %c0_i32_2 = arith.constant 0 : i32
    return %c0_i32, %c0_i32_0, %c0_i32_1 : i32, i32, i32
  }
}

</mosaic_0001>

<bundles_post_ra>
// kernel: tpu_custom_call.1
= control target key start
LH: loop header
LB: loop body
LE: loop exit
PB: predicated region body
PF: predicated region fallthrough
CT: control target
= control target key end

     0   :  { %8 = vsyncpa [#allocation5], 0  ;;  %s276_s0 = inlined_call_operand.hbm [shape: f32[2,4,256], index: 0, kind: input, shape index: {}]   ;;  %s277_s1 = inlined_call_operand.vmem [shape: f32[4,1], index: 1, kind: input, shape index: {}]   ;;  %s278_s2 = inlined_call_operand.vmem [shape: f32[4,1], index: 2, kind: input, shape index: {}]   ;;  %s279_s3 = inlined_call_operand.hbm [shape: f32[2,4,256], index: 3, kind: output, shape index: {}]  }
   0x1   :  { %9 = vsyncpa [#allocation6], 0  ;;  %s14_s14 = sshll.u32 %s276_s0, 4  ;;  %s215_s15 = smov [#allocation4]   ;;  %s15_s14 = int_to_ptr.hbm [resolvable:$true] %s14_s14 }
   0x2   :  { %s16_s16 = sshll.u32 %s215_s15, 4  ;;  %s216_s17 = smov 128   ;;  %s17_s16 = int_to_ptr.vmem [resolvable:$true] %s16_s16 }
   0x3   :  { %s217_s18 = smov 8  }
   0x4   :  { %22 = dma.hbm_to_vmem [thread:$0]  %s15_s14, 256, %s17_s16, [#allocation5], %s216_s17, %s216_s17, %s217_s18  }
   0x5   :  { %211 = dma.done.wait [#allocation5], 256  }
   0x6   :  { %212 = vsyncadd [#allocation5], 4294967040  ;;  %v218_v0 = vmov 0.0   ;;  %v248_v1 = vld [vmem:[#allocation4] sm:$0xff]  ;;  %v255_v9 = vld [vmem:[#allocation4 + $0x8] sm:$0xff]  ;;  %vm77_vm0 = vcmask 1043456  }
   0x7   :  { %31 = vst [vmem:[#allocation2] sm:$0xf] %v218_v0  ;;  %v38_v3 = vmul.f32 %v248_v1, %v248_v1  ;;  %v49_v7 = vrot.slane %v248_v1, 4  ;;  %v60_v15 = vmul.f32 %v255_v9, %v255_v9  ;;  %v71_v20 = vrot.slane %v255_v9, 4  ;;  %v90_v45 = vld [vmem:[%s277_s1] sm:$0xf] }
   0x8   :  { %32 = vst [vmem:[#allocation3] sm:$0xf] %v218_v0  ;;  %v219_v31 = vmov 0   ;;  %v103_v50 = vld [vmem:[%s278_s2] sm:$0xf]  ;;  %s221_s1 = smov [#allocation7]  }
   0x9   :  { %43 = vst [vmem:[#allocation1] ss:$2 sm:$0xff] %v248_v1  ;;  %v51_v10 = vmul.f32 %v49_v7, %v49_v7  ;;  %v73_v22 = vmul.f32 %v71_v20, %v71_v20  ;;  %159 = vset.pattern.permute.xlu1 %v219_v31  ;;  %160 = vset.pattern.permute.xlu0 %v219_v31  ;;  %v220_v52 = vmov 839922192   ;;  %s137_s22 = sshll.u32 %s221_s1, 4  ;;  %s139_s25 = sshll.u32 %s279_s3, 4  ;;  %s138_s22 = int_to_ptr.vmem [resolvable:$true] %s137_s22  ;;  %s140_s25 = int_to_ptr.hbm [resolvable:$true] %s139_s25 }
   0xa   :  { %v112_v53 = vunpack.c.l.s4 %v220_v52 }
   0xc   :  { %v113_v55 = vunpack.c.0.s8 %v112_v53 }
   0xe   :  { %v34_v2 = vld [vmem:[#allocation2] sm:$0xf] }
   0xf   :  { %v35_v4 = vadd.f32 %v34_v2, %v248_v1  ;;  %v37_v5 = vld [vmem:[#allocation3] sm:$0xf] }
  0x10   :  { %v39_v6 = vadd.f32 %v38_v3, %v37_v5  ;;  %v44_v8 = vld.sshfl [vmem:[#allocation1 + $0x8] sm:$0xff pattern:$0x75316420] }
  0x11   :  { %36 = vst [vmem:[#allocation2] sm:$0xf] %v35_v4 }
  0x12   :  { %40 = vst [vmem:[#allocation3] sm:$0xf] %v39_v6 }
  0x13   :  { %65 = vst [vmem:[#allocation1] ss:$2 sm:$0xff] %v255_v9 }
  0x18   :  { %v41_v11 = vld [vmem:[#allocation2] sm:$0xf] }
  0x19   :  { %v46_v12 = vadd.f32 %v44_v8, %v41_v11  ;;  %v48_v13 = vld [vmem:[#allocation3] sm:$0xf] }
  0x1a   :  { %v52_v14 = vadd.f32 %v51_v10, %v48_v13  ;;  %v66_v21 = vld.sshfl [vmem:[#allocation1 + $0x8] sm:$0xff pattern:$0x75316420] }
  0x1b   :  { %47 = vst [vmem:[#allocation2] sm:$0xf] %v46_v12 }
  0x1c   :  { %53 = vst [vmem:[#allocation3] sm:$0xf] %v52_v14 }
  0x22   :  { %v56_v16 = vld [vmem:[#allocation2] sm:$0xf] }
  0x23   :  { %v57_v17 = vadd.f32 %v56_v16, %v255_v9  ;;  %v59_v18 = vld [vmem:[#allocation3] sm:$0xf] }
  0x24   :  { %v61_v19 = vadd.f32 %v60_v15, %v59_v18 }
  0x25   :  { %58 = vst [vmem:[#allocation2] sm:$0xf] %v57_v17 }
  0x26   :  { %62 = vst [vmem:[#allocation3] sm:$0xf] %v61_v19 }
  0x2c   :  { %v63_v23 = vld [vmem:[#allocation2] sm:$0xf] }
  0x2d   :  { %v68_v24 = vadd.f32 %v66_v21, %v63_v23  ;;  %v70_v25 = vld [vmem:[#allocation3] sm:$0xf] }
  0x2e   :  { %v74_v26 = vadd.f32 %v73_v22, %v70_v25 }
  0x2f   :  { %69 = vst [vmem:[#allocation2] sm:$0xf] %v68_v24 }
  0x30   :  { %75 = vst [vmem:[#allocation3] sm:$0xf] %v74_v26 }
  0x36   :  { %v76_v27 = vld [vmem:[#allocation2] sm:$0xf] }
  0x37   :  { %v78_v28 = vsel %vm77_vm0, %v76_v27, 0.0  ;;  %v82_v29 = vld [vmem:[#allocation3] sm:$0xf] }
  0x38   :  { %79 = vadd.xlane.f32.xlu0 %v78_v28  ;;  %v83_v30 = vsel %vm77_vm0, %v82_v29, 0.0 }
  0x40   :  { %84 = vadd.xlane.f32.xlu0 %v83_v30 }
  0xab   :  { %v80_v32 = vpop.xlane.xlu0 %79 }
  0xac   :  { %v81_v33 = vmul.f32 0.001953125, %v80_v32 }
  0xae   :  { %v87_v35 = vmul.f32 %v81_v33, %v81_v33 }
  0xb3   :  { %v85_v34 = vpop.xlane.xlu0 %84 }
  0xb4   :  { %v86_v36 = vmul.f32 0.001953125, %v85_v34 }
  0xb6   :  { %v88_v37 = vsub.f32 %v86_v36, %v87_v35 }
  0xb8   :  { %v89_v38 = vmax.f32 %v88_v37, 0.0 }
  0xba   :  { %v91_v39 = vadd.f32 1e-05, %v89_v38 }
  0xbc   :  { %161 = vrsqrt.f32 %v91_v39  ;;  %vm98_vm2 = vweird.f32 %v91_v39 }
  0xc2   :  { %v162_v40 = vpop.eup %161 }
  0xc3   :  { %v93_v41 = vmul.f32 %v162_v40, %v91_v39  ;;  %vm99_vm1 = vweird.f32 %v162_v40 }
  0xc4   :  { %vm100_vm3 = vmor %vm98_vm2, %vm99_vm1 }
  0xc5   :  { %v94_v42 = vmul.f32 %v162_v40, %v93_v41 }
  0xc7   :  { %v95_v43 = vmul.f32 0.5, %v94_v42 }
  0xc9   :  { %v96_v44 = vsub.f32 1.5, %v95_v43 }
  0xcb   :  { %v97_v46 = vmul.f32 %v162_v40, %v96_v44 }
  0xcd   :  { %v101_v47 = vsel %vm100_vm3, %v162_v40, %v97_v46 }
  0xce   :  { %v102_v48 = vmul.f32 %v101_v47, %v90_v45 }
  0xd0   :  { %109 = vperm.xlu1 %159, %v102_v48   ;;  %v104_v49 = vmul.f32 %v102_v48, %v81_v33 }
  0xd2   :  { %v105_v51 = vsub.f32 %v103_v50, %v104_v49 }
  0xd8   :  { %119 = vperm.xlu1 %159, %v105_v51  }
 0x142   :  { %v110_v54 = vpop.permute.xlu1 %109 }
 0x143   :  { %v114_v56 = vperm.slane %v110_v54, %v113_v55 }
 0x145   :  { %v116_v58 = vmul.f32 %v114_v56, %v248_v1  ;;  %v129_v59 = vmul.f32 %v114_v56, %v255_v9 }
 0x14a   :  { %v120_v57 = vpop.permute.xlu1 %119 }
 0x14b   :  { %v124_v60 = vperm.slane %v120_v57, %v113_v55 }
 0x14d   :  { %v126_v61 = vadd.f32 %v124_v60, %v116_v58  ;;  %v130_v62 = vadd.f32 %v129_v59, %v124_v60 }
 0x14f   :  { %127 = vst [vmem:[#allocation7] sm:$0xff] %v126_v61 }
 0x150   :  { %132 = vst [vmem:[#allocation7 + $0x8] sm:$0xff] %v130_v62 }
 0x151   :  { %145 = dma.vmem_to_hbm [thread:$0]  %s138_s22, 256, %s140_s25, [#allocation6], %s216_s17, %s216_s17, %s217_s18  }
 0x152   :  { %213 = dma.done.wait [#allocation6], 256  }
 0x153   :  { %214 = vsyncadd [#allocation6], 4294967040 }
 0x154   :  { %150 = vsyncpa [#allocation5], 1 }
 0x155   :  { %151 = vsyncpa [#allocation6], 1 }

</bundles_post_ra>
